<compile_context>
chip_gen: v7x
topology: tpu7x:2x2x1
jax: 0.10.0
libtpu: 0.0.40
codegen_flags: <defaults>
</compile_context>

<pallas_src>
import functools

import jax
import jax.numpy as jnp
import numpy as np
from jax import lax
from jax.experimental import pallas as pl
from jax.experimental.pallas import tpu as pltpu


def _mha_kernel(x_ref, wq_ref, wk_ref, wv_ref, wop_ref, bias_ref, o_ref,
                k_sc, v_sc, ctx_sc, *, num_heads, head_dim, q_tile):
    qi = pl.program_id(1)          # query-tile index
    h = pl.program_id(2)           # head index (innermost, "arbitrary")
    cdt = wq_ref.dtype             # matmul operand dtype (bf16 by default)

    # ---- K/V cache: computed once per (batch, head), reused by all q-tiles.
    @pl.when(qi == 0)
    def _fill_kv():
        xs = x_ref[0].astype(cdt)                                  # (T, D)
        k_sc[h] = jnp.dot(xs, wk_ref[h],
                          preferred_element_type=jnp.float32).astype(cdt)
        v_sc[h] = jnp.dot(xs, wv_ref[h],
                          preferred_element_type=jnp.float32).astype(cdt)

    # ---- Q projection for this query tile (scale folded into Wq columns).
    q_start = pl.multiple_of(qi * q_tile, q_tile)
    xq = x_ref[0, pl.ds(q_start, q_tile), :].astype(cdt)           # (TQ, D)
    q = jnp.dot(xq, wq_ref[h], preferred_element_type=jnp.float32)  # (TQ, Dh)

    k = k_sc[h]                                                     # (T, Dh)
    v = v_sc[h]                                                     # (T, Dh)

    # ---- Scores (TQ, T) in f32; causal mask (triu, diagonal=1) -> -inf.
    s = lax.dot_general(q.astype(cdt), k, (((1,), (1,)), ((), ())),
                        preferred_element_type=jnp.float32)
    row = q_start + lax.broadcasted_iota(jnp.int32, s.shape, 0)
    col = lax.broadcasted_iota(jnp.int32, s.shape, 1)
    s = jnp.where(col > row, -jnp.inf, s)

    # ---- Softmax in f32; reciprocal on the (otherwise idle) EUP slot.
    s = s - jnp.max(s, axis=-1, keepdims=True)
    p = jnp.exp(s)
    p = p * pl.reciprocal(jnp.sum(p, axis=-1, keepdims=True), approx=True)

    # ---- Per-head context, staged for the fused output projection.
    ctx_sc[h] = jnp.dot(p.astype(cdt), v,
                        preferred_element_type=jnp.float32).astype(cdt)

    # ---- Last head: concat all heads (static offsets) and do ONE full-depth
    #      (TQ, D) @ (D, D) projection with the fused (Wo^T @ Wp^T) + bias.
    @pl.when(h == num_heads - 1)
    def _project():
        ctx = jnp.concatenate([ctx_sc[i] for i in range(num_heads)], axis=-1)
        out = jnp.dot(ctx, wop_ref[...], preferred_element_type=jnp.float32)
        o_ref[0] = (out + bias_ref[...]).astype(o_ref.dtype)


def mha_forward(x, params, num_heads, *, q_tile=None,
                compute_dtype=jnp.bfloat16):
    """x: (B, T, D) float32.  params: PyTorch-layout (out, in) weights."""
    B, T, D = x.shape
    assert D % num_heads == 0, "d_out must be divisible by num_heads"
    head_dim = D // num_heads

    if q_tile is None:
        if T <= 512:
            q_tile = T
        else:
            q_tile = next((c for c in (512, 256, 128) if T % c == 0), T)
    assert T % q_tile == 0
    num_q = T // q_tile

    f32 = jnp.float32
    scale = f32(1.0 / (head_dim ** 0.5))

    # Glue: PyTorch weights are (out, in); transpose to (in, out).
    def per_head(w_t):  # (D, D) -> (H, D, Dh), head h = columns [h*Dh:(h+1)*Dh]
        return w_t.reshape(D, num_heads, head_dim).transpose(1, 0, 2)

    wq_h = per_head(params["wq"].T.astype(f32) * scale).astype(compute_dtype)
    wk_h = per_head(params["wk"].T.astype(f32)).astype(compute_dtype)
    wv_h = per_head(params["wv"].T.astype(f32)).astype(compute_dtype)

    # Fuse out_proj and the trailing nn.Linear (no nonlinearity in between):
    #   ctx @ Wo^T @ Wp^T + bp  ==  ctx @ (Wo^T @ Wp^T) + bp
    w_op = (params["wo"].T.astype(f32) @ params["wp"].T.astype(f32)
            ).astype(compute_dtype)                                  # (D, D)
    bias = params["bp"].reshape(1, D).astype(f32)

    # Rough VMEM footprint -> scoped limit (capped at 64 MiB: safe on v5e/v6e
    # and within v7x's physical VMEM).  TODO(synk): re-derive with a flash KV
    # axis for long-T configs.
    cbytes = jnp.dtype(compute_dtype).itemsize
    est = ((2 * T * D + 2 * q_tile * D) * 4
           + (8 * D * D + 2 * T * D + q_tile * D) * cbytes
           + 8 * q_tile * T * 4)
    vmem_limit = int(min(64 * 2 ** 20, max(32 * 2 ** 20, 4 * est)))

    kernel = functools.partial(_mha_kernel, num_heads=num_heads,
                               head_dim=head_dim, q_tile=q_tile)

    return pl.pallas_call(
        kernel,
        out_shape=jax.ShapeDtypeStruct((B, T, D), x.dtype),
        grid_spec=pltpu.PrefetchScalarGridSpec(
            num_scalar_prefetch=0,
            grid=(B, num_q, num_heads),          # head axis innermost
            in_specs=[
                # Full-sequence activations for this batch (q rows sliced
                # in-kernel; block index only changes with b -> no re-DMA).
                pl.BlockSpec((1, T, D), lambda b, qi, h: (b, 0, 0)),
                # Resident per-head weight slabs (constant index maps).
                pl.BlockSpec((num_heads, D, head_dim),
                             lambda b, qi, h: (0, 0, 0)),            # Wq*scale
                pl.BlockSpec((num_heads, D, head_dim),
                             lambda b, qi, h: (0, 0, 0)),            # Wk
                pl.BlockSpec((num_heads, D, head_dim),
                             lambda b, qi, h: (0, 0, 0)),            # Wv
                pl.BlockSpec((D, D), lambda b, qi, h: (0, 0)),       # Wo@Wp
                pl.BlockSpec((1, D), lambda b, qi, h: (0, 0)),       # fused bias
            ],
            out_specs=pl.BlockSpec((1, q_tile, D), lambda b, qi, h: (b, qi, 0)),
            scratch_shapes=[
                pltpu.VMEM((num_heads, T, head_dim), compute_dtype),      # K cache
                pltpu.VMEM((num_heads, T, head_dim), compute_dtype),      # V cache
                pltpu.VMEM((num_heads, q_tile, head_dim), compute_dtype), # ctx stage
            ],
        ),
        compiler_params=pltpu.CompilerParams(
            # qi/h are "arbitrary": qi>0 reuses the KV scratch filled at qi==0
            # and h accumulates into the ctx scratch / resident output block.
            dimension_semantics=("parallel", "arbitrary", "arbitrary"),
            vmem_limit_bytes=vmem_limit,
        ),
    )(x, wq_h, wk_h, wv_h, w_op, bias)


def mha_reference(x, params, num_heads):
    """Pure-JAX reference mirroring nn.MultiheadAttention + nn.Linear."""
    B, T, D = x.shape
    head_dim = D // num_heads
    q = x @ params["wq"].T
    k = x @ params["wk"].T
    v = x @ params["wv"].T

    def split(a):  # (B, T, D) -> (B, H, T, Dh)
        return a.reshape(B, T, num_heads, head_dim).transpose(0, 2, 1, 3)

    qh, kh, vh = split(q), split(k), split(v)
    s = jnp.einsum("bhtd,bhsd->bhts", qh, kh) / jnp.sqrt(jnp.float32(head_dim))
    mask = jnp.triu(jnp.ones((T, T), dtype=bool), k=1)
    s = jnp.where(mask[None, None], -jnp.inf, s)
    p = jax.nn.softmax(s, axis=-1)
    ctx = jnp.einsum("bhts,bhsd->bhtd", p, vh)
    ctx = ctx.transpose(0, 2, 1, 3).reshape(B, T, D)
    attn_out = ctx @ params["wo"].T
    return attn_out @ params["wp"].T + params["bp"]


if __name__ == "__main__":
    # Small shapes consistent with the module: d_in == d_out, context >= T.
    B, T, D, H = 2, 8, 32, 4

    key = jax.random.PRNGKey(0)
    kx, kq, kk, kv, ko, kp, kb = jax.random.split(key, 7)

    x = jax.random.normal(kx, (B, T, D), dtype=jnp.float32)

    init = 0.1
    params = {
        "wq": init * jax.random.normal(kq, (D, D), dtype=jnp.float32),
        "wk": init * jax.random.normal(kk, (D, D), dtype=jnp.float32),
        "wv": init * jax.random.normal(kv, (D, D), dtype=jnp.float32),
        "wo": init * jax.random.normal(ko, (D, D), dtype=jnp.float32),  # MHA out_proj
        "wp": init * jax.random.normal(kp, (D, D), dtype=jnp.float32),  # self.proj weight
        "bp": init * jax.random.normal(kb, (D,), dtype=jnp.float32),    # self.proj bias
    }

    ref = mha_reference(x, params, num_heads=H)

    # f32 operands: tight check (approx EUP reciprocal + fused Wo@Wp / folded
    # scale change rounding at the ~1e-4 level).
    out_f32 = jax.block_until_ready(
        mha_forward(x, params, num_heads=H, compute_dtype=jnp.float32))
    np.testing.assert_allclose(np.asarray(out_f32), np.asarray(ref),
                               rtol=2e-3, atol=2e-3)

    # bf16 operands (default, MXU-native): looser tolerance for bf16 rounding.
    out_bf16 = jax.block_until_ready(mha_forward(x, params, num_heads=H))
    np.testing.assert_allclose(np.asarray(out_bf16), np.asarray(ref),
                               rtol=2e-2, atol=2e-2)

    print("KERNEL_OK")
</pallas_src>

<mosaic_0001>
module attributes {stable_mosaic.version = 11 : i64} {
  func.func @_mha_kernel(%arg0: i32, %arg1: i32, %arg2: i32, %arg3: memref<1x8x32xf32, #tpu.memory_space<vmem>>, %arg4: memref<4x32x8xf32, #tpu.memory_space<vmem>>, %arg5: memref<4x32x8xf32, #tpu.memory_space<vmem>>, %arg6: memref<4x32x8xf32, #tpu.memory_space<vmem>>, %arg7: memref<32x32xf32, #tpu.memory_space<vmem>>, %arg8: memref<1x32xf32, #tpu.memory_space<vmem>>, %arg9: memref<1x8x32xf32, #tpu.memory_space<vmem>>, %arg10: memref<4x8x8xf32, #tpu.memory_space<vmem>>, %arg11: memref<4x8x8xf32, #tpu.memory_space<vmem>>, %arg12: memref<4x8x8xf32, #tpu.memory_space<vmem>>) attributes {dimension_semantics = [#tpu.dimension_semantics<parallel>, #tpu.dimension_semantics<arbitrary>, #tpu.dimension_semantics<arbitrary>], iteration_bounds = array<i64: 2, 1, 4>, scalar_prefetch = 0 : i64, scratch_operands = 3 : i64, tpu.core_type = #tpu.core_type<tc>, window_params = [{transform_indices = @transform_0, window_bounds = array<i64: 1, 8, 32>}, {pipeline_mode = #tpu.pipeline_mode<synchronous>, transform_indices = @transform_1, window_bounds = array<i64: 4, 32, 8>}, {pipeline_mode = #tpu.pipeline_mode<synchronous>, transform_indices = @transform_2, window_bounds = array<i64: 4, 32, 8>}, {pipeline_mode = #tpu.pipeline_mode<synchronous>, transform_indices = @transform_3, window_bounds = array<i64: 4, 32, 8>}, {pipeline_mode = #tpu.pipeline_mode<synchronous>, transform_indices = @transform_4, window_bounds = array<i64: 32, 32>}, {pipeline_mode = #tpu.pipeline_mode<synchronous>, transform_indices = @transform_5, window_bounds = array<i64: 1, 32>}, {transform_indices = @transform_6, window_bounds = array<i64: 1, 8, 32>}]} {
    %c0_i32 = arith.constant 0 : i32
    %0 = arith.cmpi eq, %arg1, %c0_i32 : i32
    %1 = arith.extui %0 : i1 to i32
    %c0_i32_0 = arith.constant 0 : i32
    %2 = arith.cmpi ne, %1, %c0_i32_0 : i32
    scf.if %2 {
      %c0_16 = arith.constant 0 : index
      %c0_17 = arith.constant 0 : index
      %c0_18 = arith.constant 0 : index
      %44 = vector.load %arg3[%c0_16, %c0_17, %c0_18] : memref<1x8x32xf32, #tpu.memory_space<vmem>>, vector<1x8x32xf32>
      %45 = vector.shape_cast %44 : vector<1x8x32xf32> to vector<8x32xf32>
      %46 = arith.index_cast %arg2 : i32 to index
      %c0_19 = arith.constant 0 : index
      %c0_20 = arith.constant 0 : index
      %47 = vector.load %arg5[%46, %c0_19, %c0_20] : memref<4x32x8xf32, #tpu.memory_space<vmem>>, vector<1x32x8xf32>
      %48 = vector.shape_cast %47 : vector<1x32x8xf32> to vector<32x8xf32>
      %cst_21 = arith.constant dense<0.000000e+00> : vector<8x8xf32>
      %49 = tpu.matmul %45, %48, %cst_21 {dimension_numbers = #tpu.dot_dimension_numbers<[1], [0], [0], [1], [0, 0, 1, 1], [], []>} : vector<8x32xf32>, vector<32x8xf32>, vector<8x8xf32> -> vector<8x8xf32>
      %50 = arith.index_cast %arg2 : i32 to index
      %c0_22 = arith.constant 0 : index
      %c0_23 = arith.constant 0 : index
      %51 = vector.load %arg10[%50, %c0_22, %c0_23] : memref<4x8x8xf32, #tpu.memory_space<vmem>>, vector<1x8x8xf32>
      %52 = vector.shape_cast %51 : vector<1x8x8xf32> to vector<8x8xf32>
      %53 = vector.shape_cast %49 : vector<8x8xf32> to vector<1x8x8xf32>
      tpu.vector_store %arg10[%50, %c0_22, %c0_23], %53 {strides = array<i32>} : memref<4x8x8xf32, #tpu.memory_space<vmem>>, vector<1x8x8xf32>,
      %54 = arith.index_cast %arg2 : i32 to index
      %c0_24 = arith.constant 0 : index
      %c0_25 = arith.constant 0 : index
      %55 = vector.load %arg6[%54, %c0_24, %c0_25] : memref<4x32x8xf32, #tpu.memory_space<vmem>>, vector<1x32x8xf32>
      %56 = vector.shape_cast %55 : vector<1x32x8xf32> to vector<32x8xf32>
      %cst_26 = arith.constant dense<0.000000e+00> : vector<8x8xf32>
      %57 = tpu.matmul %45, %56, %cst_26 {dimension_numbers = #tpu.dot_dimension_numbers<[1], [0], [0], [1], [0, 0, 1, 1], [], []>} : vector<8x32xf32>, vector<32x8xf32>, vector<8x8xf32> -> vector<8x8xf32>
      %58 = arith.index_cast %arg2 : i32 to index
      %c0_27 = arith.constant 0 : index
      %c0_28 = arith.constant 0 : index
      %59 = vector.load %arg11[%58, %c0_27, %c0_28] : memref<4x8x8xf32, #tpu.memory_space<vmem>>, vector<1x8x8xf32>
      %60 = vector.shape_cast %59 : vector<1x8x8xf32> to vector<8x8xf32>
      %61 = vector.shape_cast %57 : vector<8x8xf32> to vector<1x8x8xf32>
      tpu.vector_store %arg11[%58, %c0_27, %c0_28], %61 {strides = array<i32>} : memref<4x8x8xf32, #tpu.memory_space<vmem>>, vector<1x8x8xf32>,
    } else {
    }
    %c8_i32 = arith.constant 8 : i32
    %3 = arith.muli %arg1, %c8_i32 : i32
    %4 = tpu.assume_multiple %3, 8 : i32
    %c0 = arith.constant 0 : index
    %5 = arith.index_cast %4 : i32 to index
    %c0_1 = arith.constant 0 : index
    %6 = vector.load %arg3[%c0, %5, %c0_1] : memref<1x8x32xf32, #tpu.memory_space<vmem>>, vector<1x8x32xf32>
    %7 = vector.shape_cast %6 : vector<1x8x32xf32> to vector<8x32xf32>
    %8 = arith.index_cast %arg2 : i32 to index
    %c0_2 = arith.constant 0 : index
    %c0_3 = arith.constant 0 : index
    %9 = vector.load %arg4[%8, %c0_2, %c0_3] : memref<4x32x8xf32, #tpu.memory_space<vmem>>, vector<1x32x8xf32>
    %10 = vector.shape_cast %9 : vector<1x32x8xf32> to vector<32x8xf32>
    %cst = arith.constant dense<0.000000e+00> : vector<8x8xf32>
    %11 = tpu.matmul %7, %10, %cst {dimension_numbers = #tpu.dot_dimension_numbers<[1], [0], [0], [1], [0, 0, 1, 1], [], []>} : vector<8x32xf32>, vector<32x8xf32>, vector<8x8xf32> -> vector<8x8xf32>
    %12 = arith.index_cast %arg2 : i32 to index
    %c0_4 = arith.constant 0 : index
    %c0_5 = arith.constant 0 : index
    %13 = vector.load %arg10[%12, %c0_4, %c0_5] : memref<4x8x8xf32, #tpu.memory_space<vmem>>, vector<1x8x8xf32>
    %14 = vector.shape_cast %13 : vector<1x8x8xf32> to vector<8x8xf32>
    %15 = arith.index_cast %arg2 : i32 to index
    %c0_6 = arith.constant 0 : index
    %c0_7 = arith.constant 0 : index
    %16 = vector.load %arg11[%15, %c0_6, %c0_7] : memref<4x8x8xf32, #tpu.memory_space<vmem>>, vector<1x8x8xf32>
    %17 = vector.shape_cast %16 : vector<1x8x8xf32> to vector<8x8xf32>
    %cst_8 = arith.constant dense<0.000000e+00> : vector<8x8xf32>
    %18 = tpu.matmul %11, %14, %cst_8 {dimension_numbers = #tpu.dot_dimension_numbers<[1], [1], [0], [0], [0, 0, 1, 0], [], []>} : vector<8x8xf32>, vector<8x8xf32>, vector<8x8xf32> -> vector<8x8xf32>
    %19 = tpu.iota {dimensions = array<i32: 0>} : vector<8x8xi32>
    %20 = vector.broadcast %4 : i32 to vector<8x8xi32>
    %21 = arith.addi %20, %19 : vector<8x8xi32>
    %22 = tpu.iota {dimensions = array<i32: 1>} : vector<8x8xi32>
    %23 = arith.cmpi sgt, %22, %21 : vector<8x8xi32>
    %cst_9 = arith.constant 0xFF800000 : f32
    %24 = vector.broadcast %cst_9 : f32 to vector<8x8xf32>
    %25 = arith.select %23, %24, %18 : vector<8x8xi1>, vector<8x8xf32>
    %cst_10 = arith.constant dense<0xFF800000> : vector<8xf32>
    %26 = vector.multi_reduction <maximumf>, %25, %cst_10 [1] : vector<8x8xf32> to vector<8xf32>
    %27 = vector.shape_cast %26 : vector<8xf32> to vector<8x1xf32>
    %28 = vector.broadcast %27 : vector<8x1xf32> to vector<8x8xf32>
    %29 = arith.subf %25, %28 : vector<8x8xf32>
    %30 = math.exp %29 : vector<8x8xf32>
    %cst_11 = arith.constant dense<0.000000e+00> : vector<8xf32>
    %31 = vector.multi_reduction <add>, %30, %cst_11 [1] : vector<8x8xf32> to vector<8xf32>
    %32 = vector.shape_cast %31 : vector<8xf32> to vector<8x1xf32>
    %33 = tpu.reciprocal %32 {approx = true} : vector<8x1xf32> -> vector<8x1xf32>
    %34 = vector.broadcast %33 : vector<8x1xf32> to vector<8x8xf32>
    %35 = arith.mulf %30, %34 : vector<8x8xf32>
    %cst_12 = arith.constant dense<0.000000e+00> : vector<8x8xf32>
    %36 = tpu.matmul %35, %17, %cst_12 {dimension_numbers = #tpu.dot_dimension_numbers<[1], [0], [0], [1], [0, 0, 1, 1], [], []>} : vector<8x8xf32>, vector<8x8xf32>, vector<8x8xf32> -> vector<8x8xf32>
    %37 = arith.index_cast %arg2 : i32 to index
    %c0_13 = arith.constant 0 : index
    %c0_14 = arith.constant 0 : index
    %38 = vector.load %arg12[%37, %c0_13, %c0_14] : memref<4x8x8xf32, #tpu.memory_space<vmem>>, vector<1x8x8xf32>
    %39 = vector.shape_cast %38 : vector<1x8x8xf32> to vector<8x8xf32>
    %40 = vector.shape_cast %36 : vector<8x8xf32> to vector<1x8x8xf32>
    tpu.vector_store %arg12[%37, %c0_13, %c0_14], %40 {strides = array<i32>} : memref<4x8x8xf32, #tpu.memory_space<vmem>>, vector<1x8x8xf32>,
    %c3_i32 = arith.constant 3 : i32
    %41 = arith.cmpi eq, %arg2, %c3_i32 : i32
    %42 = arith.extui %41 : i1 to i32
    %c0_i32_15 = arith.constant 0 : i32
    %43 = arith.cmpi ne, %42, %c0_i32_15 : i32
    scf.if %43 {
      %c0_16 = arith.constant 0 : index
      %c0_17 = arith.constant 0 : index
      %c0_18 = arith.constant 0 : index
      %44 = vector.load %arg12[%c0_16, %c0_17, %c0_18] : memref<4x8x8xf32, #tpu.memory_space<vmem>>, vector<1x8x8xf32>
      %45 = vector.shape_cast %44 : vector<1x8x8xf32> to vector<8x8xf32>
      %c1 = arith.constant 1 : index
      %c0_19 = arith.constant 0 : index
      %c0_20 = arith.constant 0 : index
      %46 = vector.load %arg12[%c1, %c0_19, %c0_20] : memref<4x8x8xf32, #tpu.memory_space<vmem>>, vector<1x8x8xf32>
      %47 = vector.shape_cast %46 : vector<1x8x8xf32> to vector<8x8xf32>
      %c2 = arith.constant 2 : index
      %c0_21 = arith.constant 0 : index
      %c0_22 = arith.constant 0 : index
      %48 = vector.load %arg12[%c2, %c0_21, %c0_22] : memref<4x8x8xf32, #tpu.memory_space<vmem>>, vector<1x8x8xf32>
      %49 = vector.shape_cast %48 : vector<1x8x8xf32> to vector<8x8xf32>
      %c3 = arith.constant 3 : index
      %c0_23 = arith.constant 0 : index
      %c0_24 = arith.constant 0 : index
      %50 = vector.load %arg12[%c3, %c0_23, %c0_24] : memref<4x8x8xf32, #tpu.memory_space<vmem>>, vector<1x8x8xf32>
      %51 = vector.shape_cast %50 : vector<1x8x8xf32> to vector<8x8xf32>
      %52 = tpu.concatenate %45, %47, %49, %51 in 1 : vector<8x8xf32>, vector<8x8xf32>, vector<8x8xf32>, vector<8x8xf32> -> vector<8x32xf32>
      %c0_25 = arith.constant 0 : index
      %c0_26 = arith.constant 0 : index
      %53 = vector.load %arg7[%c0_25, %c0_26] : memref<32x32xf32, #tpu.memory_space<vmem>>, vector<32x32xf32>
      %cst_27 = arith.constant dense<0.000000e+00> : vector<8x32xf32>
      %54 = tpu.matmul %52, %53, %cst_27 {dimension_numbers = #tpu.dot_dimension_numbers<[1], [0], [0], [1], [0, 0, 1, 1], [], []>} : vector<8x32xf32>, vector<32x32xf32>, vector<8x32xf32> -> vector<8x32xf32>
      %c0_28 = arith.constant 0 : index
      %c0_29 = arith.constant 0 : index
      %55 = vector.load %arg8[%c0_28, %c0_29] : memref<1x32xf32, #tpu.memory_space<vmem>>, vector<1x32xf32>
      %56 = vector.broadcast %55 : vector<1x32xf32> to vector<8x32xf32>
      %57 = arith.addf %54, %56 : vector<8x32xf32>
      %c0_30 = arith.constant 0 : index
      %c0_31 = arith.constant 0 : index
      %c0_32 = arith.constant 0 : index
      %58 = vector.load %arg9[%c0_30, %c0_31, %c0_32] : memref<1x8x32xf32, #tpu.memory_space<vmem>>, vector<1x8x32xf32>
      %59 = vector.shape_cast %58 : vector<1x8x32xf32> to vector<8x32xf32>
      %60 = vector.shape_cast %57 : vector<8x32xf32> to vector<1x8x32xf32>
      tpu.vector_store %arg9[%c0_30, %c0_31, %c0_32], %60 {strides = array<i32>} : memref<1x8x32xf32, #tpu.memory_space<vmem>>, vector<1x8x32xf32>,
    } else {
    }
    return
  }
  func.func @transform_0(%arg0: i32, %arg1: i32, %arg2: i32) -> (i32, i32, i32) {
    %c0_i32 = arith.constant 0 : i32
    %c0_i32_0 = arith.constant 0 : i32
    %c0_i32_1 = arith.constant 0 : i32
    return %arg0, %c0_i32, %c0_i32_0 : i32, i32, i32
  }
  func.func @transform_1(%arg0: i32, %arg1: i32, %arg2: i32) -> (i32, i32, i32) {
    %c0_i32 = arith.constant 0 : i32
    %c0_i32_0 = arith.constant 0 : i32
    %c0_i32_1 = arith.constant 0 : i32
    %c0_i32_2 = arith.constant 0 : i32
    return %c0_i32, %c0_i32_0, %c0_i32_1 : i32, i32, i32
  }
  func.func @transform_2(%arg0: i32, %arg1: i32, %arg2: i32) -> (i32, i32, i32) {
    %c0_i32 = arith.constant 0 : i32
    %c0_i32_0 = arith.constant 0 : i32
    %c0_i32_1 = arith.constant 0 : i32
    %c0_i32_2 = arith.constant 0 : i32
    return %c0_i32, %c0_i32_0, %c0_i32_1 : i32, i32, i32
  }
  func.func @transform_3(%arg0: i32, %arg1: i32, %arg2: i32) -> (i32, i32, i32) {
    %c0_i32 = arith.constant 0 : i32
    %c0_i32_0 = arith.constant 0 : i32
    %c0_i32_1 = arith.constant 0 : i32
    %c0_i32_2 = arith.constant 0 : i32
    return %c0_i32, %c0_i32_0, %c0_i32_1 : i32, i32, i32
  }
  func.func @transform_4(%arg0: i32, %arg1: i32, %arg2: i32) -> (i32, i32) {
    %c0_i32 = arith.constant 0 : i32
    %c0_i32_0 = arith.constant 0 : i32
    %c0_i32_1 = arith.constant 0 : i32
    return %c0_i32, %c0_i32_0 : i32, i32
  }
  func.func @transform_5(%arg0: i32, %arg1: i32, %arg2: i32) -> (i32, i32) {
    %c0_i32 = arith.constant 0 : i32
    %c0_i32_0 = arith.constant 0 : i32
    %c0_i32_1 = arith.constant 0 : i32
    return %c0_i32, %c0_i32_0 : i32, i32
  }
  func.func @transform_6(%arg0: i32, %arg1: i32, %arg2: i32) -> (i32, i32, i32) {
    %c0_i32 = arith.constant 0 : i32
    %c0_i32_0 = arith.constant 0 : i32
    return %arg0, %arg1, %c0_i32 : i32, i32, i32
  }
}

</mosaic_0001>

<bundles_post_ra>
// kernel: tpu_custom_call.1
= control target key start
LH: loop header
LB: loop body
LE: loop exit
PB: predicated region body
PF: predicated region fallthrough
CT: control target
= control target key end

     0   :  { %s1452_s0 = inlined_call_operand.vmem [shape: f32[2,8,32], index: 0, kind: input, shape index: {}]   ;;  %s1453_s1 = inlined_call_operand.vmem [shape: f32[4,32,8], index: 1, kind: input, shape index: {}]   ;;  %s1454_s2 = inlined_call_operand.vmem [shape: f32[4,32,8], index: 2, kind: input, shape index: {}]   ;;  %s1455_s3 = inlined_call_operand.vmem [shape: f32[4,32,8], index: 3, kind: input, shape index: {}]   ;;  %s1456_s4 = inlined_call_operand.vmem [shape: f32[32,32], index: 4, kind: input, shape index: {}]   ;;  %s1457_s5 = inlined_call_operand.vmem [shape: f32[1,32], index: 5, kind: input, shape index: {}]   ;;  %s1458_s6 = inlined_call_operand.hbm [shape: f32[2,8,32], index: 6, kind: output, shape index: {}]  }
   0x1   :  { %1460 = sst [smem:[#allocation8_spill]] %s1453_s1 }
   0x2   :  { %11 = vsyncpa [#allocation6], 0 }
   0x3   :  { %13 = vsyncpa [#allocation6 + $0x1], 0  ;;  %s1264_s21 = smov 0   ;;  %s1266_s22 = smov 0  }
   0x4   :  { %s1268_s23 = smov 0   ;;  %s1270_s24 = smov 0  }
   0x5   :  { %s1272_s25 = smov 0   ;;  %s1274_s26 = smov 0  }
   0x6   :  { %s1276_s27 = smov 0   ;;  %s1278_s28 = smov 0  }
   0x7 LB: > { %s913_s29 = sadd.s32 4294967295, %s1217_s28   ;;  %s914_s30 = sadd.s32 4294967294, %s1217_s28   ;;  %s1217_s28 = sphi %s1278_s28, %s19_s28   ;;  %s1213_s27 = sphi %s1276_s27, %s1471_s27   ;;  %s1209_s26 = sphi %s1274_s26, %s1470_s26   ;;  %s1205_s25 = sphi %s1272_s25, %s1469_s25   ;;  %s1201_s24 = sphi %s1270_s24, %s1468_s24   ;;  %s1197_s23 = sphi %s1268_s23, %s1467_s23   ;;  %s1193_s22 = sphi %s1266_s22, %s1466_s22   ;;  %s1189_s21 = sphi %s1264_s21, %s1465_s21  }
   0x8   : > { %s31_s7 = sadd.s32 1, %s1209_s26  ;;  %s38_s8 = sadd.s32 1, %s1213_s27 }
   0x9   : > { %p32_p0 = scmp.ge.s32.totalorder %s31_s7, 4  ;;  %p188_p1 = scmp.ne.s32.totalorder %s1197_s23, %s1193_s22 }
   0xa   : > { %p189_p2 = scmp.eq.s32.totalorder %s913_s29, 7  ;;  %p194_p4 = scmp.ne.s32.totalorder %s1193_s22, %s1189_s21 }
   0xb   : > { %s1473_s7 = smov (%p32_p0, %s31_s7), 0  ;;  %s1475_s8 = smov (!%p32_p0, %s38_s8), %s1213_s27 }
   0xc   : > { %p1313_p3 = por %p189_p2, %p188_p1  ;;  %p40_p5 = scmp.ge.s32.totalorder %s1475_s8, 2 }
   0xd   : > { %p195_p6 = scmp.eq.s32.totalorder %s914_s30, 7  ;;  %p917_p7 = scmp.ge.s32.totalorder %s1217_s28, 1 }
   0xe   : > { %p235_p8 = scmp.lt.s32.totalorder %s1217_s28, 9  ;;  %s1477_s8 = smov (%p40_p5, %s1475_s8), 0 }
   0xf   : > { %p1323_p9 = por %p195_p6, %p194_p4  ;;  %s173_s11 = ssub.s32 %s1213_s27, %s1477_s8 }
  0x10   : > { %p236_p10 = pnand %p917_p7, %p235_p8  ;;  %s178_s12 = sadd.s32 1, %s1197_s23 }
  0x11   : > { %p176_p11 = scmp.eq.s32.totalorder %s173_s11, 0  ;;  %s1459_s14 = sand.u32 (!%p236_p10), 1, %s1193_s22   ;;  %v1219_v0 = vmov (!%p236_p10), 0.0|0.0   ;;  %vm1220_vm0 = vmmov (!%p236_p10), 0   ;;  %v1221_v1 = vmov (!%p236_p10), 0.0   ;;  %vm279_vm1 = vcmask (!%p236_p10), 261120  }
  0x12   : > { %239 = sbr.rel (%p236_p10) target bundleno = 1362 (0x552), region = 44  ;;  %s920_s15 = sshll.u32 (!%p236_p10), %s1201_s24, 5  ;;  %1015 = vmatprep.subr.bf16.mxu0 (!%p236_p10), %v1219_v0  ;;  %969 = vmatprep.mubr.msk.f32.mxu0 (!%p236_p10), %vm1220_vm0, %v1221_v1  ;;  %vm355_vm2 = vcmask (!%p236_p10), 64512   ;;  %v599_v29 = vlaneseq (!%p236_p10) }
  0x13   : > { %s1331_s13 = scalar_select %p176_p11, %s1197_s23, %s178_s12  }
  0x14   : > { %s1337_s16 = sshll.u32 (!%p236_p10), %s1459_s14, 3  ;;  %s274_s19 = scalar_lea.vmem (!%p236_p10), %s1454_s2, %s920_s15  ;;  %1021 = vmatprep.subr.bf16.mxu1 (!%p236_p10), %v1219_v0  ;;  %980 = vmatprep.mubr.msk.f32.mxu1 (!%p236_p10), %vm1220_vm0, %v1221_v1  ;;  %v600_v30 = vshrl.u32 (!%p236_p10), %v599_v29, 7  ;;  %v604_v31 = vand.u32 (!%p236_p10), 127, %v599_v29 }
  0x15   : > { %v275_v2 = vld [vmem:[%s274_s19] sm:$0xff] (!%p236_p10)  ;;  %v276_v3 = vld [vmem:[%s274_s19 + $0x8] sm:$0xff] (!%p236_p10)  ;;  %s1463_s1 = sld [smem:[#allocation8_spill]] (!%p236_p10)  ;;  %v277_v4 = vld [vmem:[%s274_s19 + $0x10] sm:$0xff] (!%p236_p10)  ;;  %p264_p12 = scmp.lt.s32.totalorder (!%p236_p10), %s1205_s25, 1 }
  0x16   : > { %v1016_v5 = vpack.c.bf16 (!%p236_p10), %v276_v3, %v275_v2  ;;  %v278_v6 = vld [vmem:[%s274_s19 + $0x18] sm:$0xff] (!%p236_p10)  ;;  %s357_s17 = scalar_lea.vmem (!%p236_p10), %s1455_s3, %s920_s15  ;;  %vm605_vm3 = vcmp.gt.s32.totalorder (!%p236_p10), %v604_v31, %v600_v30  ;;  %p930_p13 = scmp.ne.s32.totalorder (!%p236_p10), %s1201_s24, 3 }
  0x17   : > { %v358_v7 = vld [vmem:[%s357_s17] sm:$0xff] (!%p236_p10)  ;;  %v1019_v8 = vpack.c.bf16 (!%p236_p10), %v278_v6, %v277_v4  ;;  %v359_v9 = vld [vmem:[%s357_s17 + $0x8] sm:$0xff] (!%p236_p10)  ;;  %v360_v18 = vld [vmem:[%s357_s17 + $0x10] sm:$0xff] (!%p236_p10) }
  0x18   : > { %1017 = vmatpush3.bf16.msra.mxu0 (!%p236_p10), %v1016_v5  ;;  %v1022_v12 = vpack.c.bf16 (!%p236_p10), %v359_v9, %v358_v7  ;;  %v361_v19 = vld [vmem:[%s357_s17 + $0x18] sm:$0xff] (!%p236_p10) }
  0x19   : > { %s265_s18 = scalar_select %p264_p12, %s1205_s25, 1  ;;  %1018 = vmatprep.subr.bf16.mxu0 %v1219_v0  ;;  %v1025_v20 = vpack.c.bf16 %v361_v19, %v360_v18 }
  0x1a   : > { %1023 = vmatpush3.bf16.msra.mxu1 %v1022_v12  ;;  %s1222_s11 = smov (!%p930_p13), 8   ;;  %v1223_v48 = vmov (!%p930_p13), 0.0|0.0   ;;  %v721_v49 = vld [vmem:[%s1456_s4] sm:$0xff] (!%p930_p13)  ;;  %v722_v50 = vld [vmem:[%s1456_s4 + $0x8] sm:$0xff] (!%p930_p13)  ;;  %s1224_s29 = smov (!%p930_p13), 24   ;;  %v723_v53 = vld [vmem:[%s1456_s4 + $0x10] sm:$0xff] (!%p930_p13) }
  0x1b   : > { %s438_s30 = scalar_lea.vmem %s1463_s1, %s920_s15  ;;  %s919_s20 = sshll.u32 %s265_s18, 3  ;;  %1024 = vmatprep.subr.bf16.mxu1 %v1219_v0  ;;  %v1034_v52 = vpack.c.bf16 (!%p930_p13), %v722_v50, %v721_v49  ;;  %v724_v54 = vld [vmem:[%s1456_s4 + $0x18] sm:$0xff] (!%p930_p13)  ;;  %vm1225_vm4 = vmmov (!%p930_p13), 0   ;;  %v1226_v55 = vmov (!%p930_p13), 0.0   ;;  %vm717_vm5 = vcmask (!%p930_p13), 130048  }
  0x1c   : > { %v439_v10 = vld [vmem:[%s438_s30] sm:$0xff]  ;;  %v440_v11 = vld [vmem:[%s438_s30 + $0x8] sm:$0xff]  ;;  %s267_s1 = scalar_lea.vmem %s1452_s0, %s919_s20  ;;  %1020 = vmatpush3.bf16.msra.mxu0 %v1019_v8  ;;  %v441_v15 = vld [vmem:[%s438_s30 + $0x10] sm:$0xff]  ;;  %v1037_v56 = vpack.c.bf16 (!%p930_p13), %v724_v54, %v723_v53  ;;  %vm719_vm6 = vcmask (!%p930_p13), 195584  }
  0x1d   : > { %v272_v13 = vld [vmem:[%s267_s1] sm:$0xff]  ;;  %v1028_v14 = vpack.c.bf16 %v440_v11, %v439_v10  ;;  %1027 = vmatprep.subr.bf16.mxu0 %v1219_v0  ;;  %v442_v16 = vld [vmem:[%s438_s30 + $0x18] sm:$0xff]  ;;  %s1361_s1 = sshll.u32 %s1201_s24, 3  ;;  %s263_s30 = scalar_lea.vmem [#allocation5], %s1337_s16 }
  0x1e   : > { %v1031_v17 = vpack.c.bf16 %v442_v16, %v441_v15  ;;  %1026 = vmatpush3.bf16.msra.mxu1 %v1025_v20  ;;  %s354_s14 = scalar_lea.vmem [#allocation2], %s1361_s1  ;;  %s432_s15 = scalar_lea.vmem [#allocation3], %s1361_s1 }
  0x1f   : > { %970 = vmatmul.mubr.msk.f32.vlgmr.msra.gmra.mrb[0].mxu0 %vm279_vm1, %v272_v13  ;;  %994 = vmatprep.subr.mxu1 %v1221_v1  ;;  %s691_s19 = scalar_lea.vmem [#allocation4], %s1361_s1 }
  0x20   : > { %1029 = vmatpush3.bf16.msra.mxu0 %v1028_v14  ;;  %991 = vmatprep.mubr.msk.f32.mxu0 %vm1220_vm0, %v1221_v1 }
  0x21   : > { %1030 = vmatprep.subr.bf16.mxu0 %v1219_v0  ;;  %981 = vmatmul.mubr.msk.f32.vlgmr.msra.gmra.mrb[0].mxu1 %vm279_vm1, %v272_v13  ;;  %v931_v0 = vld [vmem:[%s1457_s5] ss:$0 sm:$0xff] (!%p930_p13) }
  0x22   : > { %996 = vmatprep.mubr.msk.f32.mxu1 %vm1220_vm0, %v1221_v1 }
  0x24   : > { %1032 = vmatpush3.bf16.msra.mxu0 %v1031_v17 }
  0x25   : > { %1033 = vmatprep.subr.bf16.mxu0 (!%p930_p13), %v1223_v48 }
  0x27   : > { %992 = vmatmul.mubr.msk.f32.vlgmr.msra.gmra.mrb[2].mxu0 %vm279_vm1, %v272_v13 }
  0x28   : > { %1012 = vmatprep.mubr.msk.f32.mxu0 (!%p930_p13), %vm1225_vm4, %v1226_v55  ;;  %1035 = vmatpush3.bf16.msra.mxu0 (!%p930_p13), %v1034_v52 }
  0x29   : > { %1036 = vmatprep.subr.bf16.mxu0 (!%p930_p13), %v1223_v48 }
  0x2c   : > { %1038 = vmatpush3.bf16.msra.mxu0 (!%p930_p13), %v1037_v56 }
  0xf2   : > { %v349_v21 = vpop.f32.mrb[0].mxu0 }
  0xf3   : > { %356 = vst.msk [vmem:[%s354_s14] sm:$0xff] %vm355_vm2, %v349_v21  ;;  %v971_v22 = vpop.f32.mrb[1].mxu0 }
  0xf4   : > { %v428_v26 = vpop.f32.mrb[0].mxu1 }
  0xf5   : > { %433 = vst.msk [vmem:[%s432_s15] sm:$0xff] %vm355_vm2, %v428_v26  ;;  %v982_v27 = vpop.f32.mrb[1].mxu1 }
  0xfa   : > { %v519_v23 = vld [vmem:[%s354_s14] sm:$0xff]  ;;  %v513_v24 = vpop.f32.mrb[2].mxu0 }
  0xfb   : > { %995 = vmatpush3.xpose.msk.msra.mxu1 %vm355_vm2, %v519_v23  ;;  %v993_v25 = vpop.f32.mrb[3].mxu0 }
  0xfc   : > { %999 = vmatprep.subr.mxu1 %v1221_v1  ;;  %v521_v28 = vld [vmem:[%s432_s15] sm:$0xff] }
  0xfe   : > { %997 = vmatmul.mubr.msk.f32.vlgmr.msra.gmra.mrb[2].mxu1 %vm355_vm2, %v513_v24 }
  0xff   : > { %1001 = vmatprep.mubr.msk.f32.mxu1 %vm1220_vm0, %v1221_v1  ;;  %1000 = vmatpush3.msra.mxu1 %v521_v28 }
 0x1d1   : > { %v595_v32 = vpop.f32.mrb[2].mxu1 }
 0x1d2   : > { %v606_v33 = vsel %vm605_vm3, -inf, %v595_v32  ;;  %v998_v34 = vpop.f32.mrb[3].mxu1 }
 0x1d3   : > { %v607_v35 = vsel %vm355_vm2, %v606_v33, -inf }
 0x1d4   : > { %608 = vmax.xlane.f32.xlu0 %v607_v35 }
 0x261   : > { %v609_v36 = vpop.xlane.xlu0 %608 }
 0x262   : > { %v610_v37 = vsub.f32 %v606_v33, %v609_v36 }
 0x264   : > { %v611_v38 = vmul.f32 1.442695, %v610_v37 }
 0x266   : > { %1119 = vpow2.f32 %v611_v38 }
 0x270   : > { %v1120_v39 = vpop.eup %1119 }
 0x271   : > { %v613_v40 = vsel %vm355_vm2, %v1120_v39, 0.0 }
 0x272   : > { %614 = vadd.xlane.f32.xlu0 %v613_v40 }
 0x2ff   : > { %v615_v41 = vpop.xlane.xlu0 %614 }
 0x300   : > { %1121 = vrcp.f32 %v615_v41 }
 0x30a   : > { %v1122_v42 = vpop.eup %1121 }
 0x30b   : > { %v617_v43 = vmul.f32 %v1122_v42, %v1120_v39 }
 0x30d   : > { %1002 = vmatmul.mubr.msk.f32.vlgmr.msra.gmra.mrb[4].mxu1 %vm355_vm2, %v617_v43 }
 0x3db   : > { %696 = sbr.rel (%p930_p13) target bundleno = 1337 (0x539), region = 52 }
 0x3e0   : > { %v687_v44 = vpop.f32.mrb[4].mxu1 }
 0x3e1   : > { %692 = vst.msk [vmem:[%s691_s19] sm:$0xff] %vm355_vm2, %v687_v44  ;;  %v1003_v45 = vpop.f32.mrb[5].mxu1  ;;  %s1227_s19 = smov (!%p930_p13), 16  }
 0x3e8   : > { %v699_v46 = vld [vmem:[#allocation4 + $0x8] sm:$0xff]  ;;  %v703_v47 = vld [vmem:[#allocation4 + $0x18] sm:$0xff]  ;;  %v701_v51 = vld [vmem:[#allocation4 + $0x10] sm:$0xff] }
 0x3e9   : > { %705 = vrot.lane.b32.xlu0 %v699_v46, %s1222_s11  ;;  %713 = vrot.lane.b32.xlu1 %v703_v47, %s1224_s29  ;;  %v697_v58 = vld [vmem:[#allocation4] sm:$0xff] }
 0x3ed   : > { %709 = vrot.lane.b32.xlu0 %v701_v51, %s1227_s19 }
 0x45b   : > { %v706_v57 = vpop.permute.xlu0 %705  ;;  %v714_v59 = vpop.permute.xlu1 %713 }
 0x45c   : > { %v716_v60 = vsel %vm355_vm2, %v697_v58, %v706_v57 }
 0x45f   : > { %v710_v61 = vpop.permute.xlu0 %709 }
 0x460   : > { %v718_v62 = vsel %vm717_vm5, %v716_v60, %v710_v61 }
 0x461   : > { %v720_v63 = vsel %vm719_vm6, %v718_v62, %v714_v59 }
 0x462   : > { %1013 = vmatmul.mubr.msk.f32.vlgmr.msra.gmra.mrb[0].mxu0 %vm279_vm1, %v720_v63 }
 0x535   : > { %v801_v1 = vpop.f32.mrb[0].mxu0 }
 0x536   : > { %v802_v2 = vadd.f32 %v931_v0, %v801_v1  ;;  %v1014_v3 = vpop.f32.mrb[1].mxu0 }
 0x538   : > { %805 = vst.msk [vmem:[%s263_s30] sm:$0xff] %vm279_vm1, %v802_v2 }
 0x539 PF: > { %s934_s17 = sshll.u32 %s1205_s25, 7  ;;  %s821_s24 = sshll.u32 %s263_s30, 4  ;;  %s822_s24 = int_to_ptr.vmem [resolvable:$true] %s821_s24 }
 0x53a   : > { %s1401_s29 = scalar_lea.hbm %s1458_s6, %s934_s17  ;;  %s1464_s1 = sand.u32 1, %s1193_s22  }
 0x53b   : > { %s807_s14 = scalar_lea.sflag [#allocation6], %s1464_s1  ;;  %s1123_s15 = scalar_lea.vmem %s822_s24, 128 }
 0x53c   : > { %p1124_p0 = scmp.ne.s32.totalorder %s822_s24, %s1123_s15  ;;  %s1228_s19 = smov [#allocation5]  }
 0x53d   : > { %s1127_s11 = sshll.u32 %s1228_s19, 4  ;;  %s1128_s11 = int_to_ptr.vmem [resolvable:$false] %s1127_s11 }
 0x53e   : > { %p1125_p1 = pnand %p1124_p0, %p1313_p3  ;;  %s1129_s12 = scalar_lea.vmem %s1128_s11, 256 }
 0x53f   : > { %p1130_p4 = scmp.lt.s32.totalorder %s822_s24, %s1128_s11  ;;  %p1131_p5 = scmp.lt.s32.totalorder %s1129_s12, %s1123_s15 }
 0x540   : > { %p1126_p2 = pneg %p1125_p1 }
 0x541   : > { %p1132_p6 = por %p1131_p5, %p1130_p4 }
 0x543   : > { %p1133_p7 = pnand %p1132_p6, %p1126_p2 }
 0x545   : > { %1136 = shalt.err (!%p1133_p7)
}
 0x546   : > { %s1137_s25 = scalar_lea.hbm %s1401_s29, 128  ;;  %s1141_s17 = scalar_lea.hbm %s1458_s6, 256 }
 0x547   : > { %p1138_p8 = scmp.ne.s32.totalorder %s1401_s29, %s1137_s25  ;;  %p1142_p12 = scmp.lt.u32.totalorder %s1401_s29, %s1458_s6 }
 0x548   : > { %p1143_p13 = scmp.lt.u32.totalorder %s1141_s17, %s1137_s25  ;;  %p1145_p1 = scmp.lt.u32.totalorder %s1137_s25, %s1401_s29 }
 0x549   : > { %p1139_p10 = pnand %p1138_p8, %p1313_p3 }
 0x54a   : > { %p1144_p0 = por %p1143_p13, %p1142_p12 }
 0x54b   : > { %p1140_p11 = pneg %p1139_p10 }
 0x54c   : > { %p1146_p2 = por %p1145_p1, %p1144_p0 }
 0x54e   : > { %p1147_p4 = pnand %p1146_p2, %p1140_p11 }
 0x550   : > { %1150 = shalt.err (!%p1147_p4)
}
 0x551   : > { %1039 = dma.vmem_to_hbm [thread:$0]  (%p1313_p3), %s822_s24, 128, %s1401_s29, %s807_s14  }
 0x552 PF: > { %p1045_p5 = scmp.ge.s32.totalorder %s1217_s28, 2  ;;  %s833_s1 = sand.u32 1, %s1189_s21  }
 0x553   : > { %s834_s15 = scalar_lea.sflag [#allocation6], %s833_s1 }
 0x554   : > { %p1042_p6 = pnand %p1045_p5, %p1323_p9 }
 0x556   : > { %1184 = dma.done.wait (!%p1042_p6), %s834_s15, 128  }
 0x557   : > { %1186 = vsyncadd (!%p1042_p6), %s834_s15, 4294967168  ;;  %s19_s28 = sadd.s32 1, %s1217_s28   ;;  %s1465_s21 = smov %s1193_s22 }
 0x558   : > { %p16_p7 = scmp.ge.s32.totalorder %s19_s28, 10   ;;  %s1466_s22 = smov %s1197_s23 }
 0x559   : > { %s1467_s23 = smov %s1331_s13  ;;  %s1468_s24 = smov %s1209_s26 }
 0x55a   : > { %s1469_s25 = smov %s1213_s27  ;;  %s1470_s26 = smov %s1473_s7 }
 0x55b   : > { %s1471_s27 = smov %s1477_s8  ;;  %18 = sbr.rel (!%p16_p7) target bundleno = 7 (0x7), region = 99 }
 0x562   :  { %839 = vsyncpa [#allocation6], 1 }
 0x563   :  { %841 = vsyncpa [#allocation6 + $0x1], 1 }

</bundles_post_ra>
